<compile_context>
chip_gen: v6e
topology: v6e:2x2x1
jax: 0.10.0
libtpu: 0.0.40
codegen_flags: <defaults>
</compile_context>

<pallas_src>
import functools

import jax
import jax.numpy as jnp
from jax.experimental import pallas as pl
from jax.experimental.pallas import tpu as pltpu


def _round_up(x, m):
    return (x + m - 1) // m * m


# ----------------------------------------------------------------------------
# Kernel body: one (tm, tn) output tile, accumulated over the K grid axis.
# ----------------------------------------------------------------------------
def _gated_dense_kernel(x_ref, w_ref, b_ref, o_ref, acc_h, acc_g, *,
                        activation, fast_sigmoid):
    k = pl.program_id(2)

    @pl.when(k == 0)
    def _init():
        acc_h[...] = jnp.zeros_like(acc_h)
        acc_g[...] = jnp.zeros_like(acc_g)

    x = x_ref[...]                                   # (tm, tk) compute dtype
    acc_h[...] += jnp.dot(x, w_ref[0], preferred_element_type=jnp.float32)
    acc_g[...] += jnp.dot(x, w_ref[1], preferred_element_type=jnp.float32)

    @pl.when(k == pl.num_programs(2) - 1)
    def _epilogue():
        h = acc_h[...] + b_ref[0].astype(jnp.float32)    # (tm, tn) f32
        g = acc_g[...] + b_ref[1].astype(jnp.float32)
        if activation is not None:
            h = activation(h)
        if fast_sigmoid:
            # exp + approx reciprocal both land on the EUP slot (nearly free).
            gate = pl.reciprocal(1.0 + jnp.exp(-g), approx=True)
        else:
            gate = jax.nn.sigmoid(g)
        o_ref[...] = (h * gate).astype(o_ref.dtype)


# ----------------------------------------------------------------------------
# One-time parameter preparation (call at module init, reuse per forward).
# ----------------------------------------------------------------------------
def prepare_gated_dense_params(wh, bh, wg, bg, *, tn=256, tk=512,
                               compute_dtype=None):
    """Pad + stack the GatedDense weights once.

    wh, wg : (D_in, D_out)  -- transposed PyTorch nn.Linear weights
    bh, bg : (D_out,)
    tn, tk : output-column / reduction tile sizes (rounded to 128).
    compute_dtype : dtype fed to the MXU (e.g. jnp.bfloat16).  Accumulation
                    and the epilogue stay in f32.
    """
    D_in, D_out = wh.shape
    tn = max(128, _round_up(tn, 128))
    tk = max(128, _round_up(tk, 128))

    tn_eff = min(tn, _round_up(D_out, 128))
    Dp = _round_up(D_out, tn_eff)            # multiple of tn_eff -> full grid coverage
    if D_in <= tk:                           # K fits one tile: no K padding needed
        tk_eff, Kp = D_in, D_in
    else:
        tk_eff = tk
        Kp = _round_up(D_in, tk_eff)

    cdt = compute_dtype if compute_dtype is not None else wh.dtype

    w = jnp.stack([wh, wg], axis=0)                                  # (2, D_in, D_out)
    w = jnp.pad(w, ((0, 0), (0, Kp - D_in), (0, Dp - D_out))).astype(cdt)
    b = jnp.stack([bh, bg], axis=0).reshape(2, 1, D_out)
    b = jnp.pad(b, ((0, 0), (0, 0), (0, Dp - D_out))).astype(jnp.float32)

    return dict(w=w, b=b, D_in=D_in, D_out=D_out, Kp=Kp, Dp=Dp,
                tk=tk_eff, tn=tn_eff, compute_dtype=cdt)


# ----------------------------------------------------------------------------
# Forward pass.
# ----------------------------------------------------------------------------
def gated_dense_apply(x, params, *, activation=None, tm=256,
                      fast_sigmoid=False, out_dtype=None):
    B, D_in = x.shape
    assert D_in == params["D_in"], "input feature size mismatch"
    Kp, Dp = params["Kp"], params["Dp"]
    tk, tn = params["tk"], params["tn"]
    cdt = params["compute_dtype"]
    out_dtype = out_dtype if out_dtype is not None else x.dtype

    sublane = 16 if cdt == jnp.bfloat16 else 8      # bf16 packs 16 sublanes/vreg
    tm = max(sublane, _round_up(tm, sublane))
    tm_eff = min(tm, _round_up(B, sublane))
    Bp = _round_up(B, tm_eff)

    xp = x
    if (Bp, Kp) != (B, D_in):
        xp = jnp.pad(x, ((0, Bp - B), (0, Kp - D_in)))   # defined zeros in padding
    xp = xp.astype(cdt)

    grid_n, grid_m, grid_k = Dp // tn, Bp // tm_eff, Kp // tk
    grid = (grid_n, grid_m, grid_k)     # N outer, M inner, K innermost (reduction)

    kernel = functools.partial(_gated_dense_kernel,
                               activation=activation, fast_sigmoid=fast_sigmoid)

    x_item = jnp.dtype(cdt).itemsize
    out_item = jnp.dtype(out_dtype).itemsize
    # Actual HBM traffic: x re-streams once per N tile; weights re-stream once
    # per M tile only when K is tiled (otherwise they stay VMEM-resident).
    w_reads = grid_m if grid_k > 1 else 1
    cost = pl.CostEstimate(
        flops=int(4 * Bp * Kp * Dp),
        transcendentals=int(Bp * Dp),
        bytes_accessed=int(x_item * Bp * Kp * grid_n
                           + x_item * 2 * Kp * Dp * w_reads
                           + 4 * 2 * Dp
                           + out_item * Bp * Dp),
    )

    # Per-step VMEM footprint (double-buffered inputs + output + accumulators),
    # with headroom, capped safely below v7x's 64 MiB physical VMEM.
    step_in = tm_eff * tk * x_item + 2 * tk * tn * x_item + 2 * tn * 4
    vmem_need = 2 * step_in + 2 * tm_eff * tn * out_item + 2 * tm_eff * tn * 4
    vmem_limit = int(min(max(2 * vmem_need, 32 * 1024 * 1024), 56 * 1024 * 1024))

    out = pl.pallas_call(
        kernel,
        out_shape=jax.ShapeDtypeStruct((Bp, Dp), out_dtype),
        grid_spec=pltpu.PrefetchScalarGridSpec(
            num_scalar_prefetch=0,
            grid=grid,
            in_specs=[
                pl.BlockSpec((tm_eff, tk), lambda j, i, k: (i, k)),   # x tile
                pl.BlockSpec((2, tk, tn), lambda j, i, k: (0, k, j)), # stacked Wh/Wg
                pl.BlockSpec((2, 1, tn), lambda j, i, k: (0, 0, j)),  # stacked bh/bg
            ],
            out_specs=pl.BlockSpec((tm_eff, tn), lambda j, i, k: (i, j)),
            scratch_shapes=[
                pltpu.VMEM((tm_eff, tn), jnp.float32),   # h accumulator
                pltpu.VMEM((tm_eff, tn), jnp.float32),   # g accumulator
            ],
        ),
        compiler_params=pltpu.CompilerParams(
            dimension_semantics=("parallel", "parallel", "arbitrary"),
            vmem_limit_bytes=vmem_limit,
        ),
        cost_estimate=cost,
    )(xp, params["w"], params["b"])

    return out[:B, : params["D_out"]]


def gated_dense(x, wh, bh, wg, bg, *, activation=None, tm=256, tn=256, tk=512,
                compute_dtype=None, fast_sigmoid=False):
    """Convenience one-shot wrapper (prefer hoisting prepare_* to module init)."""
    params = prepare_gated_dense_params(wh, bh, wg, bg, tn=tn, tk=tk,
                                        compute_dtype=compute_dtype)
    return gated_dense_apply(x, params, activation=activation, tm=tm,
                             fast_sigmoid=fast_sigmoid)


# TODO(synk): for quantized weights, add an int8 (v5e/v6e) / fp8 (v7x) weight
# path with per-tile dequant scales applied in the f32 epilogue.


if __name__ == "__main__":
    key = jax.random.PRNGKey(0)

    def make(B, D_in, D_out, k):
        kx, kwh, kbh, kwg, kbg = jax.random.split(k, 5)
        bound = 1.0 / jnp.sqrt(D_in)
        x = jax.random.normal(kx, (B, D_in), dtype=jnp.float32)
        wh = jax.random.uniform(kwh, (D_in, D_out), minval=-bound, maxval=bound,
                                dtype=jnp.float32)
        bh = jax.random.uniform(kbh, (D_out,), minval=-bound, maxval=bound,
                                dtype=jnp.float32)
        wg = jax.random.uniform(kwg, (D_in, D_out), minval=-bound, maxval=bound,
                                dtype=jnp.float32)
        bg = jax.random.uniform(kbg, (D_out,), minval=-bound, maxval=bound,
                                dtype=jnp.float32)
        return x, wh, bh, wg, bg

    def ref_fn(x, wh, bh, wg, bg, activation=None):
        h = x @ wh + bh
        if activation is not None:
            h = activation(h)
        return h * jax.nn.sigmoid(x @ wg + bg)

    k1, k2, k3 = jax.random.split(key, 3)

    # 1) Module-sized f32 case (batch=8, input_size=32, output_size=64),
    #    activation=None matches the PyTorch module's default.
    x, wh, bh, wg, bg = make(8, 32, 64, k1)
    params = prepare_gated_dense_params(wh, bh, wg, bg)
    out = jax.block_until_ready(gated_dense_apply(x, params))
    ref = ref_fn(x, wh, bh, wg, bg)
    assert out.shape == ref.shape
    assert jnp.allclose(out, ref, atol=1e-5, rtol=1e-5)

    # 2) Ragged shapes: exercises K tiling (D_in=700 > tk=128), D_in/D_out
    #    zero-padding, and the fixed N-grid coverage (Dp=512, tn=256).
    x, wh, bh, wg, bg = make(5, 700, 300, k2)
    params = prepare_gated_dense_params(wh, bh, wg, bg, tn=256, tk=128)
    out = jax.block_until_ready(gated_dense_apply(x, params, tm=128))
    ref = ref_fn(x, wh, bh, wg, bg)
    assert out.shape == ref.shape
    assert jnp.allclose(out, ref, atol=1e-4, rtol=1e-4)

    # 3) bf16 compute path (halved HBM traffic / full-rate MXU) + EUP sigmoid.
    x, wh, bh, wg, bg = make(8, 32, 64, k3)
    params = prepare_gated_dense_params(wh, bh, wg, bg,
                                        compute_dtype=jnp.bfloat16)
    out = jax.block_until_ready(
        gated_dense_apply(x, params, fast_sigmoid=True, out_dtype=jnp.float32))
    ref = ref_fn(x, wh, bh, wg, bg)
    assert out.shape == ref.shape
    assert jnp.allclose(out, ref, atol=3e-2, rtol=3e-2)

    print("KERNEL_OK")
</pallas_src>

<mosaic_0001>
module attributes {stable_mosaic.version = 11 : i64} {
  func.func @_gated_dense_kernel(%arg0: i32, %arg1: i32, %arg2: i32, %arg3: memref<8x32xf32, #tpu.memory_space<vmem>>, %arg4: memref<2x32x128xf32, #tpu.memory_space<vmem>>, %arg5: memref<2x1x128xf32, #tpu.memory_space<vmem>>, %arg6: memref<8x128xf32, #tpu.memory_space<vmem>>, %arg7: memref<8x128xf32, #tpu.memory_space<vmem>>, %arg8: memref<8x128xf32, #tpu.memory_space<vmem>>) attributes {dimension_semantics = [#tpu.dimension_semantics<parallel>, #tpu.dimension_semantics<parallel>, #tpu.dimension_semantics<arbitrary>], iteration_bounds = array<i64: 1, 1, 1>, scalar_prefetch = 0 : i64, scratch_operands = 2 : i64, tpu.core_type = #tpu.core_type<tc>, window_params = [{transform_indices = @transform_0, window_bounds = array<i64: 8, 32>}, {transform_indices = @transform_1, window_bounds = array<i64: 2, 32, 128>}, {transform_indices = @transform_2, window_bounds = array<i64: 2, 1, 128>}, {transform_indices = @transform_3, window_bounds = array<i64: 8, 128>}]} {
    %c0_i32 = arith.constant 0 : i32
    %0 = arith.cmpi eq, %arg2, %c0_i32 : i32
    %1 = arith.extui %0 : i1 to i32
    %c0_i32_0 = arith.constant 0 : i32
    %2 = arith.cmpi ne, %1, %c0_i32_0 : i32
    scf.if %2 {
      %cst_18 = arith.constant 0.000000e+00 : f32
      %19 = vector.broadcast %cst_18 : f32 to vector<8x128xf32>
      %c0_19 = arith.constant 0 : index
      %c0_20 = arith.constant 0 : index
      %20 = vector.load %arg7[%c0_19, %c0_20] : memref<8x128xf32, #tpu.memory_space<vmem>>, vector<8x128xf32>
      tpu.vector_store %arg7[%c0_19, %c0_20], %19 {strides = array<i32>} : memref<8x128xf32, #tpu.memory_space<vmem>>, vector<8x128xf32>,
      %cst_21 = arith.constant 0.000000e+00 : f32
      %21 = vector.broadcast %cst_21 : f32 to vector<8x128xf32>
      %c0_22 = arith.constant 0 : index
      %c0_23 = arith.constant 0 : index
      %22 = vector.load %arg8[%c0_22, %c0_23] : memref<8x128xf32, #tpu.memory_space<vmem>>, vector<8x128xf32>
      tpu.vector_store %arg8[%c0_22, %c0_23], %21 {strides = array<i32>} : memref<8x128xf32, #tpu.memory_space<vmem>>, vector<8x128xf32>,
    } else {
    }
    %c0 = arith.constant 0 : index
    %c0_1 = arith.constant 0 : index
    %3 = vector.load %arg3[%c0, %c0_1] : memref<8x32xf32, #tpu.memory_space<vmem>>, vector<8x32xf32>
    %c0_2 = arith.constant 0 : index
    %c0_3 = arith.constant 0 : index
    %4 = vector.load %arg7[%c0_2, %c0_3] : memref<8x128xf32, #tpu.memory_space<vmem>>, vector<8x128xf32>
    %c0_4 = arith.constant 0 : index
    %c0_5 = arith.constant 0 : index
    %c0_6 = arith.constant 0 : index
    %5 = vector.load %arg4[%c0_4, %c0_5, %c0_6] : memref<2x32x128xf32, #tpu.memory_space<vmem>>, vector<1x32x128xf32>
    %6 = vector.shape_cast %5 : vector<1x32x128xf32> to vector<32x128xf32>
    %cst = arith.constant dense<0.000000e+00> : vector<8x128xf32>
    %7 = tpu.matmul %3, %6, %cst {dimension_numbers = #tpu.dot_dimension_numbers<[1], [0], [0], [1], [0, 0, 1, 1], [], []>} : vector<8x32xf32>, vector<32x128xf32>, vector<8x128xf32> -> vector<8x128xf32>
    %8 = arith.addf %4, %7 : vector<8x128xf32>
    %c0_7 = arith.constant 0 : index
    %c0_8 = arith.constant 0 : index
    %9 = vector.load %arg7[%c0_7, %c0_8] : memref<8x128xf32, #tpu.memory_space<vmem>>, vector<8x128xf32>
    tpu.vector_store %arg7[%c0_7, %c0_8], %8 {strides = array<i32>} : memref<8x128xf32, #tpu.memory_space<vmem>>, vector<8x128xf32>,
    %c0_9 = arith.constant 0 : index
    %c0_10 = arith.constant 0 : index
    %10 = vector.load %arg8[%c0_9, %c0_10] : memref<8x128xf32, #tpu.memory_space<vmem>>, vector<8x128xf32>
    %c1 = arith.constant 1 : index
    %c0_11 = arith.constant 0 : index
    %c0_12 = arith.constant 0 : index
    %11 = vector.load %arg4[%c1, %c0_11, %c0_12] : memref<2x32x128xf32, #tpu.memory_space<vmem>>, vector<1x32x128xf32>
    %12 = vector.shape_cast %11 : vector<1x32x128xf32> to vector<32x128xf32>
    %cst_13 = arith.constant dense<0.000000e+00> : vector<8x128xf32>
    %13 = tpu.matmul %3, %12, %cst_13 {dimension_numbers = #tpu.dot_dimension_numbers<[1], [0], [0], [1], [0, 0, 1, 1], [], []>} : vector<8x32xf32>, vector<32x128xf32>, vector<8x128xf32> -> vector<8x128xf32>
    %14 = arith.addf %10, %13 : vector<8x128xf32>
    %c0_14 = arith.constant 0 : index
    %c0_15 = arith.constant 0 : index
    %15 = vector.load %arg8[%c0_14, %c0_15] : memref<8x128xf32, #tpu.memory_space<vmem>>, vector<8x128xf32>
    tpu.vector_store %arg8[%c0_14, %c0_15], %14 {strides = array<i32>} : memref<8x128xf32, #tpu.memory_space<vmem>>, vector<8x128xf32>,
    %c0_i32_16 = arith.constant 0 : i32
    %16 = arith.cmpi eq, %arg2, %c0_i32_16 : i32
    %17 = arith.extui %16 : i1 to i32
    %c0_i32_17 = arith.constant 0 : i32
    %18 = arith.cmpi ne, %17, %c0_i32_17 : i32
    scf.if %18 {
      %c0_18 = arith.constant 0 : index
      %c0_19 = arith.constant 0 : index
      %19 = vector.load %arg7[%c0_18, %c0_19] : memref<8x128xf32, #tpu.memory_space<vmem>>, vector<8x128xf32>
      %c0_20 = arith.constant 0 : index
      %c0_21 = arith.constant 0 : index
      %c0_22 = arith.constant 0 : index
      %20 = vector.load %arg5[%c0_20, %c0_21, %c0_22] : memref<2x1x128xf32, #tpu.memory_space<vmem>>, vector<1x1x128xf32>
      %21 = vector.shape_cast %20 : vector<1x1x128xf32> to vector<1x128xf32>
      %22 = vector.broadcast %21 : vector<1x128xf32> to vector<8x128xf32>
      %23 = arith.addf %19, %22 : vector<8x128xf32>
      %c0_23 = arith.constant 0 : index
      %c0_24 = arith.constant 0 : index
      %24 = vector.load %arg8[%c0_23, %c0_24] : memref<8x128xf32, #tpu.memory_space<vmem>>, vector<8x128xf32>
      %c1_25 = arith.constant 1 : index
      %c0_26 = arith.constant 0 : index
      %c0_27 = arith.constant 0 : index
      %25 = vector.load %arg5[%c1_25, %c0_26, %c0_27] : memref<2x1x128xf32, #tpu.memory_space<vmem>>, vector<1x1x128xf32>
      %26 = vector.shape_cast %25 : vector<1x1x128xf32> to vector<1x128xf32>
      %27 = vector.broadcast %26 : vector<1x128xf32> to vector<8x128xf32>
      %28 = arith.addf %24, %27 : vector<8x128xf32>
      %29 = arith.negf %28 : vector<8x128xf32>
      %30 = math.exp %29 : vector<8x128xf32>
      %cst_28 = arith.constant 1.000000e+00 : f32
      %31 = vector.broadcast %cst_28 : f32 to vector<8x128xf32>
      %32 = arith.addf %31, %30 : vector<8x128xf32>
      %33 = arith.divf %31, %32 : vector<8x128xf32>
      %34 = arith.mulf %23, %33 : vector<8x128xf32>
      %c0_29 = arith.constant 0 : index
      %c0_30 = arith.constant 0 : index
      %35 = vector.load %arg6[%c0_29, %c0_30] : memref<8x128xf32, #tpu.memory_space<vmem>>, vector<8x128xf32>
      tpu.vector_store %arg6[%c0_29, %c0_30], %34 {strides = array<i32>} : memref<8x128xf32, #tpu.memory_space<vmem>>, vector<8x128xf32>,
    } else {
    }
    return
  }
  func.func @transform_0(%arg0: i32, %arg1: i32, %arg2: i32) -> (i32, i32) {
    %c0_i32 = arith.constant 0 : i32
    return %arg1, %arg2 : i32, i32
  }
  func.func @transform_1(%arg0: i32, %arg1: i32, %arg2: i32) -> (i32, i32, i32) {
    %c0_i32 = arith.constant 0 : i32
    %c0_i32_0 = arith.constant 0 : i32
    return %c0_i32, %arg2, %arg0 : i32, i32, i32
  }
  func.func @transform_2(%arg0: i32, %arg1: i32, %arg2: i32) -> (i32, i32, i32) {
    %c0_i32 = arith.constant 0 : i32
    %c0_i32_0 = arith.constant 0 : i32
    %c0_i32_1 = arith.constant 0 : i32
    return %c0_i32, %c0_i32_0, %arg0 : i32, i32, i32
  }
  func.func @transform_3(%arg0: i32, %arg1: i32, %arg2: i32) -> (i32, i32) {
    %c0_i32 = arith.constant 0 : i32
    return %arg1, %arg0 : i32, i32
  }
}

</mosaic_0001>

<bundles_post_ra>
// kernel: tpu_custom_call.1
= control target key start
LH: loop header
LB: loop body
LE: loop exit
PB: predicated region body
PF: predicated region fallthrough
CT: control target
= control target key end

     0   :  { %8 = vsyncpa [#allocation5], 0  ;;  %s410_s0 = inlined_call_operand.hbm [shape: f32[8,32], index: 0, kind: input, shape index: {}]   ;;  %s411_s1 = inlined_call_operand.hbm [shape: f32[2,32,128], index: 1, kind: input, shape index: {}]   ;;  %s412_s2 = inlined_call_operand.vmem [shape: f32[2,1,128], index: 2, kind: input, shape index: {}]   ;;  %s413_s3 = inlined_call_operand.hbm [shape: f32[8,128], index: 3, kind: output, shape index: {}]  }
   0x1   :  { %9 = vsyncpa [#allocation8], 0 }
   0x2   :  { %10 = vsyncpa [#allocation6], 0  ;;  %s368_s12 = smov [#allocation4]   ;;  %s369_s14 = smov [#allocation7]  }
   0x3   :  { %s17_s13 = sshll.u32 %s368_s12, 4  ;;  %s26_s15 = sshll.u32 %s369_s14, 4  ;;  %s18_s13 = int_to_ptr.vmem [resolvable:$true] %s17_s13  ;;  %s27_s15 = int_to_ptr.vmem [resolvable:$true] %s26_s15 }
   0x4   :  { %s310_s16 = scalar_lea.vmem %s18_s13, 128  ;;  %p315_p1 = scmp.lt.s32.totalorder %s18_s13, %s18_s13 }
   0x5   :  { %p311_p0 = scmp.ne.s32.totalorder %s18_s13, %s310_s16  ;;  %p316_p2 = scmp.lt.s32.totalorder %s310_s16, %s310_s16 }
   0x7   :  { %p317_p3 = por %p316_p2, %p315_p1 }
   0x9   :  { %p318_p4 = pnand %p317_p3, %p311_p0 }
   0xb   :  { %321 = shalt.err (!%p318_p4)
}
   0xc   :  { %20 = dma.hbm_to_vmem [thread:$0]  %s410_s0, 128, %s18_s13, [#allocation5]  }
   0xd   :  { %s330_s19 = scalar_lea.vmem %s27_s15, 1024  ;;  %p335_p6 = scmp.lt.s32.totalorder %s27_s15, %s27_s15 }
   0xe   :  { %p331_p5 = scmp.ne.s32.totalorder %s27_s15, %s330_s19  ;;  %p336_p7 = scmp.lt.s32.totalorder %s330_s19, %s330_s19 }
  0x10   :  { %p337_p8 = por %p336_p7, %p335_p6 }
  0x12   :  { %p338_p9 = pnand %p337_p8, %p331_p5 }
  0x14   :  { %341 = shalt.err (!%p338_p9)
}
  0x15   :  { %s370_s20 = smov 128   ;;  %s371_s21 = smov 8  }
  0x16   :  { %32 = dma.hbm_to_vmem [thread:$0]  %s411_s1, 1024, %s27_s15, [#allocation8], %s370_s20, %s370_s20, %s371_s21  }
  0x17   :  { %362 = dma.done.wait [#allocation5], 128  }
  0x18   :  { %363 = vsyncadd [#allocation5], 4294967168 }
  0x19   :  { %364 = dma.done.wait [#allocation8], 1024  }
  0x1a   :  { %365 = vsyncadd [#allocation8], 4294966272  ;;  %v372_v0 = vmov 0.0   ;;  %vm373_vm0 = vmmov 0   ;;  %v134_v1 = vld [vmem:[#allocation7 + $0x38] sm:$0xff]  ;;  %v133_v2 = vld [vmem:[#allocation7 + $0x30] sm:$0xff] }
  0x1b   :  { %280 = vmatprep.subr.mxu1 %v372_v0  ;;  %288 = vmatprep.mubr.msk.f32.mxu1 %vm373_vm0, %v372_v0  ;;  %v52_v3 = vld [vmem:[#allocation7 + $0x18] sm:$0xff]  ;;  %v132_v4 = vld [vmem:[#allocation7 + $0x28] sm:$0xff]  ;;  %v51_v5 = vld [vmem:[#allocation7 + $0x10] sm:$0xff]  ;;  %vm53_vm1 = vcmask 261120   ;;  %s374_s26 = smov [#allocation9]  }
  0x1c   :  { %269 = vmatprep.subr.mxu0 %v372_v0  ;;  %277 = vmatprep.mubr.msk.f32.mxu0 %vm373_vm0, %v372_v0  ;;  %v50_v6 = vld [vmem:[#allocation7 + $0x8] sm:$0xff]  ;;  %v131_v7 = vld [vmem:[#allocation7 + $0x20] sm:$0xff]  ;;  %v47_v8 = vld [vmem:[#allocation4] sm:$0xff]  ;;  %s243_s27 = sshll.u32 %s374_s26, 4  ;;  %s244_s27 = int_to_ptr.vmem [resolvable:$true] %s243_s27 }
  0x1d   :  { %281 = vmatpush3.msra.mxu1 %v134_v1  ;;  %270 = vmatpush3.msra.mxu0 %v52_v3  ;;  %v49_v9 = vld [vmem:[#allocation7] sm:$0xff]  ;;  %v257_v10 = vld [vmem:[%s412_s2 + $0x1] ss:$0 sm:$0xff]  ;;  %v255_v19 = vld [vmem:[%s412_s2] ss:$0 sm:$0xff]  ;;  %s342_s28 = scalar_lea.vmem %s244_s27, 128  ;;  %p347_p11 = scmp.lt.s32.totalorder %s244_s27, %s244_s27 }
  0x1e   :  { %282 = vmatprep.subr.mxu1 %v372_v0  ;;  %271 = vmatprep.subr.mxu0 %v372_v0  ;;  %p343_p10 = scmp.ne.s32.totalorder %s244_s27, %s342_s28  ;;  %p348_p12 = scmp.lt.s32.totalorder %s342_s28, %s342_s28 }
  0x1f   :  { %283 = vmatpush3.msra.mxu1 %v133_v2  ;;  %272 = vmatpush3.msra.mxu0 %v51_v5 }
  0x20   :  { %284 = vmatprep.subr.mxu1 %v372_v0  ;;  %273 = vmatprep.subr.mxu0 %v372_v0  ;;  %p349_p13 = por %p348_p12, %p347_p11 }
  0x21   :  { %285 = vmatpush3.msra.mxu1 %v132_v4  ;;  %274 = vmatpush3.msra.mxu0 %v50_v6 }
  0x22   :  { %286 = vmatprep.subr.mxu1 %v372_v0  ;;  %275 = vmatprep.subr.mxu0 %v372_v0  ;;  %p350_p0 = pnand %p349_p13, %p343_p10 }
  0x23   :  { %287 = vmatpush3.msra.mxu1 %v131_v7  ;;  %276 = vmatpush3.msra.mxu0 %v49_v9 }
  0x24   :  { %289 = vmatmul.mubr.msk.f32.vlgmr.msra.gmra.mxu1 %vm53_vm1, %v47_v8  ;;  %278 = vmatmul.mubr.msk.f32.vlgmr.msra.gmra.mxu0 %vm53_vm1, %v47_v8 }
  0xe4   :  { %v201_v11 = vpop.f32.mrf.mxu1  ;;  %v123_v13 = vpop.f32.mrf.mxu0 }
  0xe5   :  { %v228_v12 = vadd.f32 %v257_v10, %v201_v11  ;;  %v218_v20 = vadd.f32 %v255_v19, %v123_v13 }
  0xe6   :  { %v290_v14 = vpop.f32.mrf.mxu1  ;;  %v279_v16 = vpop.f32.mrf.mxu0 }
  0xe7   :  { %v258_v15 = vmul.f32 -1.442695, %v228_v12 }
  0xe9   :  { %298 = vpow2.f32 %v258_v15 }
  0xf6   :  { %v299_v17 = vpop.eup %298 }
  0xf7   :  { %v232_v18 = vadd.f32 1.0, %v299_v17 }
  0xf9   :  { %300 = vrcp.f32 %v232_v18 }
 0x106   :  { %v301_v21 = vpop.eup %300 }
 0x107   :  { %v235_v22 = vmul.f32 %v301_v21, %v218_v20 }
 0x109   :  { %236 = vst [vmem:[#allocation9] sm:$0xff] %v235_v22 }
 0x10a   :  { %353 = shalt.err (!%p350_p0)
}
 0x10b   :  { %246 = dma.vmem_to_hbm [thread:$0]  %s244_s27, 128, %s413_s3, [#allocation6]  }
 0x10c   :  { %366 = dma.done.wait [#allocation6], 128  }
 0x10d   :  { %367 = vsyncadd [#allocation6], 4294967168 }
 0x10e   :  { %250 = vsyncpa [#allocation5], 1 }
 0x10f   :  { %251 = vsyncpa [#allocation8], 1 }
 0x110   :  { %252 = vsyncpa [#allocation6], 1 }

</bundles_post_ra>
